<compile_context>
chip_gen: v7x
topology: tpu7x:2x2x1
jax: 0.10.0
libtpu: 0.0.40
codegen_flags: <defaults>
</compile_context>

<pallas_src>
import functools

import jax
import jax.numpy as jnp
from jax.experimental import pallas as pl
from jax.experimental.pallas import tpu as pltpu


def _round_up(x, m):
    return ((x + m - 1) // m) * m


def _sublane_multiple(dtype):
    itemsize = jnp.dtype(dtype).itemsize
    return {4: 8, 2: 16, 1: 32}.get(itemsize, 8)


def _outconv_kernel(w_ref, b_ref, x_ref, o_ref):
    """1x1 conv on one (C_in, S, 128) slab -> (C_out, S, 128) slab.

    w_ref: SMEM (C_out*C_in,) f32   (flattened to avoid 2-D SMEM word padding)
    b_ref: SMEM (C_out,)     f32
    x_ref: VMEM (C_in, S, 128)
    o_ref: VMEM (C_out, S, 128)
    """
    c_in = x_ref.shape[0]
    c_out = o_ref.shape[0]
    s, lanes = x_ref.shape[1], x_ref.shape[2]

    # Tiny contraction: scalar-broadcast VPU FMAs over full (S, 128) dense
    # slabs; f32 accumulate, one whole-block store per output channel.
    for co in range(c_out):
        acc = jnp.full((s, lanes), b_ref[co], dtype=jnp.float32)
        for ci in range(c_in):
            acc = acc + x_ref[ci].astype(jnp.float32) * w_ref[co * c_in + ci]
        o_ref[co] = acc.astype(o_ref.dtype)


def _pick_spatial_tile(cols, sub_mult, target_s):
    """Pick S (number of 128-lane column blocks per grid step) and padded cols.

    Prefers (a) the full extent for small inputs, (b) a divisor of `cols`
    (no whole-array pad/slice round trip), (c) a padded fallback.
    """
    target_s = max(sub_mult, (target_s // sub_mult) * sub_mult)
    if cols <= target_s:
        return cols, cols                       # one full-extent block
    s = target_s
    while s >= sub_mult:
        if cols % s == 0:
            break
        s -= sub_mult
    # Accept a divisor only if it still amortizes the ~0.35 us per-step cost
    # (>= 64 column blocks = 8K spatial elements per step); otherwise pad.
    if s >= sub_mult and cols % s == 0 and s >= min(64, target_s):
        return s, cols
    return target_s, _round_up(cols, target_s)


@functools.partial(jax.jit, static_argnames=("target_spatial",))
def outconv_forward(x_nchw, weight, bias, target_spatial=512 * 128):
    """outconv.forward (dropout=False): 1x1 Conv2d over an NCHW input.

    x_nchw: (N, C_in, H, W)
    weight: (C_out, C_in)   -- squeezed from PyTorch's (C_out, C_in, 1, 1)
    bias:   (C_out,)
    returns (N, C_out, H, W)
    """
    N, C_in, H, W = x_nchw.shape
    C_out = weight.shape[0]
    HW = H * W
    itemsize = jnp.dtype(x_nchw.dtype).itemsize
    sub_mult = _sublane_multiple(x_nchw.dtype)

    # View the flattened spatial axis as (cols, 128) column blocks.
    HW128 = _round_up(HW, 128)
    cols = HW128 // 128
    S, cols_pad = _pick_spatial_tile(cols, sub_mult, target_spatial // 128)
    HW_pad = cols_pad * 128

    x3 = x_nchw.reshape(N, C_in, HW)            # contiguous reshape, no transpose
    if HW_pad != HW:
        x3 = jnp.pad(x3, ((0, 0), (0, 0), (0, HW_pad - HW)))
    x4 = x3.reshape(N, C_in, cols_pad, 128)

    grid = (N, cols_pad // S)

    # Double-buffered input+output blocks; only raise the scoped VMEM limit if
    # a user-chosen tile actually needs it (default tile needs ~4 MiB).
    block_bytes = (C_in + C_out) * S * 128 * itemsize
    vmem_need = 2 * block_bytes + (1 << 20)
    cp_kwargs = dict(dimension_semantics=("parallel", "parallel"))
    if vmem_need > 32 * 1024 * 1024:
        cp_kwargs["vmem_limit_bytes"] = vmem_need
    compiler_params = pltpu.CompilerParams(**cp_kwargs)

    cost = pl.CostEstimate(
        flops=2 * N * C_out * C_in * HW_pad,
        transcendentals=0,
        bytes_accessed=N * (C_in + C_out) * HW_pad * itemsize,
    )

    out4 = pl.pallas_call(
        _outconv_kernel,
        out_shape=jax.ShapeDtypeStruct((N, C_out, cols_pad, 128), x_nchw.dtype),
        grid_spec=pl.GridSpec(
            grid=grid,
            in_specs=[
                # Tiny weight / bias: scalar memory, whole-array, fetched once.
                pl.BlockSpec(memory_space=pltpu.MemorySpace.SMEM),
                pl.BlockSpec(memory_space=pltpu.MemorySpace.SMEM),
                # x slab: (C_in, S, 128); leading N dim squeezed out.
                pl.BlockSpec((None, C_in, S, 128), lambda n, j: (n, 0, j, 0)),
            ],
            out_specs=pl.BlockSpec((None, C_out, S, 128),
                                   lambda n, j: (n, 0, j, 0)),
        ),
        compiler_params=compiler_params,
        cost_estimate=cost,
    )(weight.reshape(-1).astype(jnp.float32), bias.astype(jnp.float32), x4)

    out3 = out4.reshape(N, C_out, HW_pad)
    if HW_pad != HW:
        out3 = out3[:, :, :HW]
    return out3.reshape(N, C_out, H, W)


def _reference(x_nchw, weight, bias):
    # out[n, co, h, w] = sum_ci weight[co, ci] * x[n, ci, h, w] + bias[co]
    return (
        jnp.einsum("nchw,oc->nohw", x_nchw, weight)
        + bias[None, :, None, None]
    )


if __name__ == "__main__":
    key = jax.random.PRNGKey(0)
    k_x, k_w, k_b = jax.random.split(key, 3)

    N, C_in, H, W = 2, 4, 16, 16
    C_out = 3

    x = jax.random.normal(k_x, (N, C_in, H, W), dtype=jnp.float32)

    # Deterministic init mimicking PyTorch Conv2d default:
    # U(-1/sqrt(fan_in), +1/sqrt(fan_in)) with fan_in = C_in * 1 * 1.
    fan_in = C_in * 1 * 1
    bound = 1.0 / (fan_in ** 0.5)
    weight = jax.random.uniform(k_w, (C_out, C_in), minval=-bound, maxval=bound,
                                dtype=jnp.float32)
    bias = jax.random.uniform(k_b, (C_out,), minval=-bound, maxval=bound,
                              dtype=jnp.float32)

    out = outconv_forward(x, weight, bias)
    out = jax.block_until_ready(out)

    ref = _reference(x, weight, bias)
    assert out.shape == (N, C_out, H, W), out.shape
    assert jnp.allclose(out, ref, atol=1e-5, rtol=1e-5), "mismatch vs reference"

    print("KERNEL_OK")
</pallas_src>

<mosaic_0001>
module attributes {stable_mosaic.version = 11 : i64} {
  func.func @_outconv_kernel(%arg0: i32, %arg1: i32, %arg2: memref<12xf32, #tpu.memory_space<smem>>, %arg3: memref<3xf32, #tpu.memory_space<smem>>, %arg4: memref<1x4x2x128xf32, #tpu.memory_space<vmem>>, %arg5: memref<1x3x2x128xf32, #tpu.memory_space<vmem>>) attributes {dimension_semantics = [#tpu.dimension_semantics<parallel>, #tpu.dimension_semantics<parallel>], iteration_bounds = array<i64: 2, 1>, scalar_prefetch = 0 : i64, scratch_operands = 0 : i64, tpu.core_type = #tpu.core_type<tc>, window_params = [{transform_indices = @transform_0, window_bounds = array<i64: 12>}, {transform_indices = @transform_1, window_bounds = array<i64: 3>}, {transform_indices = @transform_2, window_bounds = array<i64: 1, 4, 2, 128>}, {transform_indices = @transform_3, window_bounds = array<i64: 1, 3, 2, 128>}]} {
    %c0 = arith.constant 0 : index
    %0 = memref.load %arg3[%c0] : memref<3xf32, #tpu.memory_space<smem>>
    %1 = vector.broadcast %0 : f32 to vector<2x128xf32>
    %c0_0 = arith.constant 0 : index
    %c0_1 = arith.constant 0 : index
    %c0_2 = arith.constant 0 : index
    %c0_3 = arith.constant 0 : index
    %2 = vector.load %arg4[%c0_0, %c0_1, %c0_2, %c0_3] : memref<1x4x2x128xf32, #tpu.memory_space<vmem>>, vector<1x1x2x128xf32>
    %3 = vector.shape_cast %2 : vector<1x1x2x128xf32> to vector<2x128xf32>
    %c0_4 = arith.constant 0 : index
    %4 = memref.load %arg2[%c0_4] : memref<12xf32, #tpu.memory_space<smem>>
    %5 = vector.broadcast %4 : f32 to vector<2x128xf32>
    %6 = arith.mulf %3, %5 : vector<2x128xf32>
    %7 = arith.addf %1, %6 : vector<2x128xf32>
    %c0_5 = arith.constant 0 : index
    %c1 = arith.constant 1 : index
    %c0_6 = arith.constant 0 : index
    %c0_7 = arith.constant 0 : index
    %8 = vector.load %arg4[%c0_5, %c1, %c0_6, %c0_7] : memref<1x4x2x128xf32, #tpu.memory_space<vmem>>, vector<1x1x2x128xf32>
    %9 = vector.shape_cast %8 : vector<1x1x2x128xf32> to vector<2x128xf32>
    %c1_8 = arith.constant 1 : index
    %10 = memref.load %arg2[%c1_8] : memref<12xf32, #tpu.memory_space<smem>>
    %11 = vector.broadcast %10 : f32 to vector<2x128xf32>
    %12 = arith.mulf %9, %11 : vector<2x128xf32>
    %13 = arith.addf %7, %12 : vector<2x128xf32>
    %c0_9 = arith.constant 0 : index
    %c2 = arith.constant 2 : index
    %c0_10 = arith.constant 0 : index
    %c0_11 = arith.constant 0 : index
    %14 = vector.load %arg4[%c0_9, %c2, %c0_10, %c0_11] : memref<1x4x2x128xf32, #tpu.memory_space<vmem>>, vector<1x1x2x128xf32>
    %15 = vector.shape_cast %14 : vector<1x1x2x128xf32> to vector<2x128xf32>
    %c2_12 = arith.constant 2 : index
    %16 = memref.load %arg2[%c2_12] : memref<12xf32, #tpu.memory_space<smem>>
    %17 = vector.broadcast %16 : f32 to vector<2x128xf32>
    %18 = arith.mulf %15, %17 : vector<2x128xf32>
    %19 = arith.addf %13, %18 : vector<2x128xf32>
    %c0_13 = arith.constant 0 : index
    %c3 = arith.constant 3 : index
    %c0_14 = arith.constant 0 : index
    %c0_15 = arith.constant 0 : index
    %20 = vector.load %arg4[%c0_13, %c3, %c0_14, %c0_15] : memref<1x4x2x128xf32, #tpu.memory_space<vmem>>, vector<1x1x2x128xf32>
    %21 = vector.shape_cast %20 : vector<1x1x2x128xf32> to vector<2x128xf32>
    %c3_16 = arith.constant 3 : index
    %22 = memref.load %arg2[%c3_16] : memref<12xf32, #tpu.memory_space<smem>>
    %23 = vector.broadcast %22 : f32 to vector<2x128xf32>
    %24 = arith.mulf %21, %23 : vector<2x128xf32>
    %25 = arith.addf %19, %24 : vector<2x128xf32>
    %c0_17 = arith.constant 0 : index
    %c0_18 = arith.constant 0 : index
    %c0_19 = arith.constant 0 : index
    %c0_20 = arith.constant 0 : index
    %26 = vector.load %arg5[%c0_17, %c0_18, %c0_19, %c0_20] : memref<1x3x2x128xf32, #tpu.memory_space<vmem>>, vector<1x1x2x128xf32>
    %27 = vector.shape_cast %26 : vector<1x1x2x128xf32> to vector<2x128xf32>
    %28 = vector.shape_cast %25 : vector<2x128xf32> to vector<1x1x2x128xf32>
    tpu.vector_store %arg5[%c0_17, %c0_18, %c0_19, %c0_20], %28 {strides = array<i32>} : memref<1x3x2x128xf32, #tpu.memory_space<vmem>>, vector<1x1x2x128xf32>,
    %c1_21 = arith.constant 1 : index
    %29 = memref.load %arg3[%c1_21] : memref<3xf32, #tpu.memory_space<smem>>
    %30 = vector.broadcast %29 : f32 to vector<2x128xf32>
    %c0_22 = arith.constant 0 : index
    %c0_23 = arith.constant 0 : index
    %c0_24 = arith.constant 0 : index
    %c0_25 = arith.constant 0 : index
    %31 = vector.load %arg4[%c0_22, %c0_23, %c0_24, %c0_25] : memref<1x4x2x128xf32, #tpu.memory_space<vmem>>, vector<1x1x2x128xf32>
    %32 = vector.shape_cast %31 : vector<1x1x2x128xf32> to vector<2x128xf32>
    %c4 = arith.constant 4 : index
    %33 = memref.load %arg2[%c4] : memref<12xf32, #tpu.memory_space<smem>>
    %34 = vector.broadcast %33 : f32 to vector<2x128xf32>
    %35 = arith.mulf %32, %34 : vector<2x128xf32>
    %36 = arith.addf %30, %35 : vector<2x128xf32>
    %c0_26 = arith.constant 0 : index
    %c1_27 = arith.constant 1 : index
    %c0_28 = arith.constant 0 : index
    %c0_29 = arith.constant 0 : index
    %37 = vector.load %arg4[%c0_26, %c1_27, %c0_28, %c0_29] : memref<1x4x2x128xf32, #tpu.memory_space<vmem>>, vector<1x1x2x128xf32>
    %38 = vector.shape_cast %37 : vector<1x1x2x128xf32> to vector<2x128xf32>
    %c5 = arith.constant 5 : index
    %39 = memref.load %arg2[%c5] : memref<12xf32, #tpu.memory_space<smem>>
    %40 = vector.broadcast %39 : f32 to vector<2x128xf32>
    %41 = arith.mulf %38, %40 : vector<2x128xf32>
    %42 = arith.addf %36, %41 : vector<2x128xf32>
    %c0_30 = arith.constant 0 : index
    %c2_31 = arith.constant 2 : index
    %c0_32 = arith.constant 0 : index
    %c0_33 = arith.constant 0 : index
    %43 = vector.load %arg4[%c0_30, %c2_31, %c0_32, %c0_33] : memref<1x4x2x128xf32, #tpu.memory_space<vmem>>, vector<1x1x2x128xf32>
    %44 = vector.shape_cast %43 : vector<1x1x2x128xf32> to vector<2x128xf32>
    %c6 = arith.constant 6 : index
    %45 = memref.load %arg2[%c6] : memref<12xf32, #tpu.memory_space<smem>>
    %46 = vector.broadcast %45 : f32 to vector<2x128xf32>
    %47 = arith.mulf %44, %46 : vector<2x128xf32>
    %48 = arith.addf %42, %47 : vector<2x128xf32>
    %c0_34 = arith.constant 0 : index
    %c3_35 = arith.constant 3 : index
    %c0_36 = arith.constant 0 : index
    %c0_37 = arith.constant 0 : index
    %49 = vector.load %arg4[%c0_34, %c3_35, %c0_36, %c0_37] : memref<1x4x2x128xf32, #tpu.memory_space<vmem>>, vector<1x1x2x128xf32>
    %50 = vector.shape_cast %49 : vector<1x1x2x128xf32> to vector<2x128xf32>
    %c7 = arith.constant 7 : index
    %51 = memref.load %arg2[%c7] : memref<12xf32, #tpu.memory_space<smem>>
    %52 = vector.broadcast %51 : f32 to vector<2x128xf32>
    %53 = arith.mulf %50, %52 : vector<2x128xf32>
    %54 = arith.addf %48, %53 : vector<2x128xf32>
    %c0_38 = arith.constant 0 : index
    %c1_39 = arith.constant 1 : index
    %c0_40 = arith.constant 0 : index
    %c0_41 = arith.constant 0 : index
    %55 = vector.load %arg5[%c0_38, %c1_39, %c0_40, %c0_41] : memref<1x3x2x128xf32, #tpu.memory_space<vmem>>, vector<1x1x2x128xf32>
    %56 = vector.shape_cast %55 : vector<1x1x2x128xf32> to vector<2x128xf32>
    %57 = vector.shape_cast %54 : vector<2x128xf32> to vector<1x1x2x128xf32>
    tpu.vector_store %arg5[%c0_38, %c1_39, %c0_40, %c0_41], %57 {strides = array<i32>} : memref<1x3x2x128xf32, #tpu.memory_space<vmem>>, vector<1x1x2x128xf32>,
    %c2_42 = arith.constant 2 : index
    %58 = memref.load %arg3[%c2_42] : memref<3xf32, #tpu.memory_space<smem>>
    %59 = vector.broadcast %58 : f32 to vector<2x128xf32>
    %c0_43 = arith.constant 0 : index
    %c0_44 = arith.constant 0 : index
    %c0_45 = arith.constant 0 : index
    %c0_46 = arith.constant 0 : index
    %60 = vector.load %arg4[%c0_43, %c0_44, %c0_45, %c0_46] : memref<1x4x2x128xf32, #tpu.memory_space<vmem>>, vector<1x1x2x128xf32>
    %61 = vector.shape_cast %60 : vector<1x1x2x128xf32> to vector<2x128xf32>
    %c8 = arith.constant 8 : index
    %62 = memref.load %arg2[%c8] : memref<12xf32, #tpu.memory_space<smem>>
    %63 = vector.broadcast %62 : f32 to vector<2x128xf32>
    %64 = arith.mulf %61, %63 : vector<2x128xf32>
    %65 = arith.addf %59, %64 : vector<2x128xf32>
    %c0_47 = arith.constant 0 : index
    %c1_48 = arith.constant 1 : index
    %c0_49 = arith.constant 0 : index
    %c0_50 = arith.constant 0 : index
    %66 = vector.load %arg4[%c0_47, %c1_48, %c0_49, %c0_50] : memref<1x4x2x128xf32, #tpu.memory_space<vmem>>, vector<1x1x2x128xf32>
    %67 = vector.shape_cast %66 : vector<1x1x2x128xf32> to vector<2x128xf32>
    %c9 = arith.constant 9 : index
    %68 = memref.load %arg2[%c9] : memref<12xf32, #tpu.memory_space<smem>>
    %69 = vector.broadcast %68 : f32 to vector<2x128xf32>
    %70 = arith.mulf %67, %69 : vector<2x128xf32>
    %71 = arith.addf %65, %70 : vector<2x128xf32>
    %c0_51 = arith.constant 0 : index
    %c2_52 = arith.constant 2 : index
    %c0_53 = arith.constant 0 : index
    %c0_54 = arith.constant 0 : index
    %72 = vector.load %arg4[%c0_51, %c2_52, %c0_53, %c0_54] : memref<1x4x2x128xf32, #tpu.memory_space<vmem>>, vector<1x1x2x128xf32>
    %73 = vector.shape_cast %72 : vector<1x1x2x128xf32> to vector<2x128xf32>
    %c10 = arith.constant 10 : index
    %74 = memref.load %arg2[%c10] : memref<12xf32, #tpu.memory_space<smem>>
    %75 = vector.broadcast %74 : f32 to vector<2x128xf32>
    %76 = arith.mulf %73, %75 : vector<2x128xf32>
    %77 = arith.addf %71, %76 : vector<2x128xf32>
    %c0_55 = arith.constant 0 : index
    %c3_56 = arith.constant 3 : index
    %c0_57 = arith.constant 0 : index
    %c0_58 = arith.constant 0 : index
    %78 = vector.load %arg4[%c0_55, %c3_56, %c0_57, %c0_58] : memref<1x4x2x128xf32, #tpu.memory_space<vmem>>, vector<1x1x2x128xf32>
    %79 = vector.shape_cast %78 : vector<1x1x2x128xf32> to vector<2x128xf32>
    %c11 = arith.constant 11 : index
    %80 = memref.load %arg2[%c11] : memref<12xf32, #tpu.memory_space<smem>>
    %81 = vector.broadcast %80 : f32 to vector<2x128xf32>
    %82 = arith.mulf %79, %81 : vector<2x128xf32>
    %83 = arith.addf %77, %82 : vector<2x128xf32>
    %c0_59 = arith.constant 0 : index
    %c2_60 = arith.constant 2 : index
    %c0_61 = arith.constant 0 : index
    %c0_62 = arith.constant 0 : index
    %84 = vector.load %arg5[%c0_59, %c2_60, %c0_61, %c0_62] : memref<1x3x2x128xf32, #tpu.memory_space<vmem>>, vector<1x1x2x128xf32>
    %85 = vector.shape_cast %84 : vector<1x1x2x128xf32> to vector<2x128xf32>
    %86 = vector.shape_cast %83 : vector<2x128xf32> to vector<1x1x2x128xf32>
    tpu.vector_store %arg5[%c0_59, %c2_60, %c0_61, %c0_62], %86 {strides = array<i32>} : memref<1x3x2x128xf32, #tpu.memory_space<vmem>>, vector<1x1x2x128xf32>,
    return
  }
  func.func @transform_0(%arg0: i32, %arg1: i32) -> i32 {
    %c0_i32 = arith.constant 0 : i32
    %c0_i32_0 = arith.constant 0 : i32
    return %c0_i32 : i32
  }
  func.func @transform_1(%arg0: i32, %arg1: i32) -> i32 {
    %c0_i32 = arith.constant 0 : i32
    %c0_i32_0 = arith.constant 0 : i32
    return %c0_i32 : i32
  }
  func.func @transform_2(%arg0: i32, %arg1: i32) -> (i32, i32, i32, i32) {
    %c0_i32 = arith.constant 0 : i32
    %c0_i32_0 = arith.constant 0 : i32
    %c0_i32_1 = arith.constant 0 : i32
    return %arg0, %c0_i32, %arg1, %c0_i32_0 : i32, i32, i32, i32
  }
  func.func @transform_3(%arg0: i32, %arg1: i32) -> (i32, i32, i32, i32) {
    %c0_i32 = arith.constant 0 : i32
    %c0_i32_0 = arith.constant 0 : i32
    %c0_i32_1 = arith.constant 0 : i32
    return %arg0, %c0_i32, %arg1, %c0_i32_0 : i32, i32, i32, i32
  }
}

</mosaic_0001>

<bundles_post_ra>
// kernel: outconv_forward.1
= control target key start
LH: loop header
LB: loop body
LE: loop exit
PB: predicated region body
PF: predicated region fallthrough
CT: control target
= control target key end

     0   :  { %8 = vsyncpa [#allocation3], 0  ;;  %s687_s0 = inlined_call_operand.vmem [shape: f32[12], index: 0, kind: input, shape index: {}]   ;;  %s688_s1 = inlined_call_operand.vmem [shape: f32[3], index: 1, kind: input, shape index: {}]   ;;  %s689_s2 = inlined_call_operand.vmem [shape: f32[2,4,2,128], index: 2, kind: input, shape index: {}]   ;;  %s690_s3 = inlined_call_operand.vmem [shape: f32[2,3,2,128], index: 3, kind: output, shape index: {}]  }
   0x1   :  { %9 = vsyncpa [#allocation5], 0  ;;  %s578_s12 = smov 0   ;;  %s580_s13 = smov 0  }
   0x2   :  { %s582_s14 = smov 0  }
   0x3 LB: > { %s409_s15 = sadd.s32 4294967295, %s554_s14   ;;  %s27_s16 = sadd.s32 1, %s550_s13  ;;  %s554_s14 = sphi %s582_s14, %s15_s14   ;;  %s550_s13 = sphi %s580_s13, %s700_s13   ;;  %s546_s12 = sphi %s578_s12, %s699_s12  }
   0x4   : > { %p29_p0 = scmp.ge.s32.totalorder %s27_s16, 2  ;;  %p411_p1 = scmp.ge.s32.totalorder %s554_s14, 1 }
   0x5   : > { %p130_p2 = scmp.lt.s32.totalorder %s554_s14, 3  ;;  %p603_p4 = scmp.eq.s32.totalorder %s409_s15, 0 }
   0x6   : > { %s702_s16 = smov (%p29_p0, %s27_s16), 0  ;;  %s143_s21 = sshll.u32 %s687_s0, 4  ;;  %s144_s21 = int_to_ptr.vmem [resolvable:$true] %s143_s21 }
   0x7   : > { %p599_p3 = pnand %p411_p1, %p130_p2  ;;  %s154_s24 = sshll.u32 %s688_s1, 4  ;;  %s155_s24 = int_to_ptr.vmem [resolvable:$true] %s154_s24 }
   0x8   : > { %s695_s18 = scalar_select %p603_p4, 1, 0 }
   0x9   : > { %s694_s17 = scalar_select %p599_p3, 1, 0 }
   0xa   : > { %p457_p5 = pneg %p599_p3  ;;  %s494_s26 = scalar_lea.vmem %s144_s21, 16 }
   0xb   : > { %p495_p7 = scmp.ne.s32.totalorder %s144_s21, %s494_s26  ;;  %p502_p11 = scmp.lt.s32.totalorder %s144_s21, %s144_s21 }
   0xc   : > { %p617_p6 = pnand %p603_p4, %p457_p5  ;;  %p503_p12 = scmp.lt.s32.totalorder %s494_s26, %s494_s26 }
   0xe   : > { %p496_p8 = pneg %p617_p6  ;;  %p504_p13 = por %p503_p12, %p502_p11 }
  0x10   : > { %p497_p9 = pnand %p496_p8, %p495_p7 }
  0x12   : > { %p498_p10 = pneg %p497_p9 }
  0x14   : > { %p505_p0 = pnand %p504_p13, %p498_p10 }
  0x16   : > { %508 = shalt.err (!%p505_p0)
}
  0x17   : > { %s556_s27 = smov [#allocation2]   ;;  %s509_s28 = scalar_lea.vmem %s155_s24, 16 }
  0x18   : > { %460 = dma.vmem_to_smem (!%p617_p6), %s144_s21, 16, %s556_s27, [#allocation3]  }
  0x19   : > { %p510_p1 = scmp.ne.s32.totalorder %s155_s24, %s509_s28  ;;  %p517_p4 = scmp.lt.s32.totalorder %s155_s24, %s155_s24 }
  0x1a   : > { %p518_p3 = scmp.lt.s32.totalorder %s509_s28, %s509_s28 }
  0x1b   : > { %p512_p2 = pnand %p510_p1, %p496_p8 }
  0x1c   : > { %p519_p7 = por %p518_p3, %p517_p4 }
  0x1d   : > { %p513_p5 = pneg %p512_p2 }
  0x1f   : > { %p520_p9 = pnand %p519_p7, %p513_p5 }
  0x21   : > { %523 = shalt.err (!%p520_p9)
}
  0x22   : > { %s557_s29 = smov [#allocation4]   ;;  %p697_p10 = scmp.ne.s32.totalorder %s694_s17, 0 }
  0x23   : > { %463 = dma.vmem_to_smem (!%p617_p6), %s155_s24, 16, %s557_s29, [#allocation5]  }
  0x24   : > { %178 = sbr.rel (%p697_p10) target bundleno = 75 (0x4b), region = 32  ;;  %p698_p11 = scmp.ne.s32.totalorder (!%p697_p10), %s695_s18, 0 }
  0x2b   : > { %537 = dma.done.wait (%p698_p11), [#allocation3], 16  }
  0x2c   : > { %539 = vsyncadd (%p698_p11), [#allocation3], 4294967280 }
  0x2d   : > { %541 = dma.done.wait (%p698_p11), [#allocation5], 16  }
  0x2e   : > { %543 = vsyncadd (%p698_p11), [#allocation5], 4294967280 }
  0x2f   : > { %188 = sfence }
  0x30   : > { %p213_p3 = scmp.lt.s32.totalorder %s546_s12, 1  ;;  %s229_s30 = sld [smem:[#allocation4]] }
  0x31   : > { %s232_s4 = sld [smem:[#allocation2]]  ;;  %s422_s5 = sld [smem:[#allocation2 + $0x1]] }
  0x32   : > { %s704_s12 = smov (!%p213_p3, %s546_s12), 1  ;;  %s424_s6 = sld [smem:[#allocation2 + $0x2]] }
  0x33   : > { %s426_s7 = sld [smem:[#allocation2 + $0x3]]  ;;  %s447_s8 = sshll.u32 %s704_s12, 3 }
  0x34   : > { %s645_s11 = scalar_lea.vmem %s689_s2, %s447_s8  ;;  %s647_s15 = sld [smem:[#allocation4 + $0x1]] }
  0x35   : > { %v231_v0 = vld [vmem:[%s645_s11] sm:$0x3]  ;;  %v421_v1 = vld [vmem:[%s645_s11 + $0x2] sm:$0x3]  ;;  %v423_v5 = vld [vmem:[%s645_s11 + $0x4] sm:$0x3] }
  0x36   : > { %v230_v2 = vstv %s229_s30  ;;  %s428_s17 = sld [smem:[#allocation2 + $0x4]]  ;;  %s430_s18 = sld [smem:[#allocation2 + $0x5]]  ;;  %v425_v9 = vld [vmem:[%s645_s11 + $0x6] sm:$0x3]  ;;  %v257_v13 = vld [vmem:[%s645_s11] sm:$0x3] }
  0x37   : > { %v233_v3 = vstv %s232_s4  ;;  %v239_v4 = vstv %s422_s5  ;;  %s432_s19 = sld [smem:[#allocation2 + $0x6]]  ;;  %s434_s20 = sld [smem:[#allocation2 + $0x7]]  ;;  %v429_v16 = vld [vmem:[%s645_s11 + $0x2] sm:$0x3]  ;;  %v431_v19 = vld [vmem:[%s645_s11 + $0x4] sm:$0x3] }
  0x38   : > { %v234_v6 = vmul.f32 %v233_v3, %v231_v0  ;;  %v240_v7 = vmul.f32 %v421_v1, %v239_v4  ;;  %v245_v8 = vstv %s424_s6  ;;  %s653_s21 = sld [smem:[#allocation4 + $0x2]]  ;;  %s655_s22 = sld [smem:[#allocation2 + $0x8]]  ;;  %v433_v23 = vld [vmem:[%s645_s11 + $0x6] sm:$0x3]  ;;  %v281_v27 = vld [vmem:[%s645_s11] sm:$0x3] }
  0x39   : > { %v251_v10 = vstv %s426_s7  ;;  %v246_v12 = vmul.f32 %v423_v5, %v245_v8  ;;  %s448_s23 = smul.u32 6, %s704_s12  ;;  %s439_s24 = sld [smem:[#allocation2 + $0x9]]  ;;  %v438_v28 = vld [vmem:[%s645_s11 + $0x2] sm:$0x3]  ;;  %v440_v36 = vld [vmem:[%s645_s11 + $0x4] sm:$0x3] }
  0x3a   : > { %v235_v11 = vadd.f32 %v234_v6, %v230_v2  ;;  %v252_v15 = vmul.f32 %v425_v9, %v251_v10  ;;  %s660_s25 = sld [smem:[#allocation2 + $0xa]]  ;;  %s662_s26 = sld [smem:[#allocation2 + $0xb]]  ;;  %v256_v17 = vstv %s647_s15  ;;  %v442_v41 = vld [vmem:[%s645_s11 + $0x6] sm:$0x3] }
  0x3b   : > { %s228_s28 = scalar_lea.vmem %s690_s3, %s448_s23 }
  0x3c   : > { %v241_v14 = vadd.f32 %v240_v7, %v235_v11  ;;  %v259_v18 = vstv %s428_s17  ;;  %v264_v22 = vstv %s430_s18 }
  0x3d   : > { %v260_v21 = vmul.f32 %v259_v18, %v257_v13  ;;  %v265_v24 = vmul.f32 %v429_v16, %v264_v22  ;;  %v269_v25 = vstv %s432_s19  ;;  %v274_v26 = vstv %s434_s20 }
  0x3e   : > { %v247_v20 = vadd.f32 %v246_v12, %v241_v14  ;;  %v270_v31 = vmul.f32 %v431_v19, %v269_v25  ;;  %v275_v32 = vmul.f32 %v433_v23, %v274_v26  ;;  %v280_v33 = vstv %s653_s21 }
  0x3f   : > { %v261_v30 = vadd.f32 %v260_v21, %v256_v17  ;;  %v283_v34 = vstv %s655_s22  ;;  %v288_v35 = vstv %s439_s24 }
  0x40   : > { %v253_v29 = vadd.f32 %v252_v15, %v247_v20  ;;  %v284_v38 = vmul.f32 %v283_v34, %v281_v27  ;;  %v289_v39 = vmul.f32 %v438_v28, %v288_v35  ;;  %v293_v40 = vstv %s660_s25 }
  0x41   : > { %v266_v37 = vadd.f32 %v265_v24, %v261_v30  ;;  %v298_v42 = vstv %s662_s26  ;;  %v294_v45 = vmul.f32 %v440_v36, %v293_v40 }
  0x42   : > { %254 = vst [vmem:[%s228_s28] sm:$0x3] %v253_v29  ;;  %v285_v44 = vadd.f32 %v284_v38, %v280_v33  ;;  %v299_v48 = vmul.f32 %v442_v41, %v298_v42 }
  0x43   : > { %v271_v43 = vadd.f32 %v270_v31, %v266_v37 }
  0x44   : > { %v290_v47 = vadd.f32 %v289_v39, %v285_v44 }
  0x45   : > { %v276_v46 = vadd.f32 %v275_v32, %v271_v43 }
  0x46   : > { %v295_v49 = vadd.f32 %v294_v45, %v290_v47 }
  0x47   : > { %435 = vst [vmem:[%s228_s28 + $0x2] sm:$0x3] %v276_v46 }
  0x48   : > { %v300_v50 = vadd.f32 %v299_v48, %v295_v49 }
  0x4a   : > { %444 = vst [vmem:[%s228_s28 + $0x4] sm:$0x3] %v300_v50 }
  0x4b PF: > { %s15_s14 = sadd.s32 1, %s554_s14   ;;  %s699_s12 = smov %s550_s13 }
  0x4c   : > { %p12_p4 = scmp.ge.s32.totalorder %s15_s14, 4   ;;  %s700_s13 = smov %s702_s16 }
  0x4e   :  { %14 = sbr.rel (!%p12_p4) target bundleno = 3 (0x3), region = 76 }
  0x55   :  { %330 = vsyncpa [#allocation3], 1 }
  0x56   :  { %332 = vsyncpa [#allocation3 + $0x1], 1 }
  0x57   :  { %333 = vsyncpa [#allocation5], 1 }

</bundles_post_ra>
